<compile_context>
chip_gen: v6e
topology: v6e:2x2x1
jax: 0.10.0
libtpu: 0.0.40
codegen_flags: <defaults>
</compile_context>

<pallas_src>
import math

import jax
import jax.numpy as jnp
from jax.experimental import pallas as pl
from jax.experimental.pallas import tpu as pltpu

BIG = 3.0e38  # "minus infinity" stand-in for the masked running max


def _round_up(v, m):
    return ((v + m - 1) // m) * m


# ----------------------------- Pallas kernel ------------------------------ #
def _sa_pointconv_kernel(feat_ref, mask_ref, w1_ref, w2_ref, b2_ref, out_ref):
    """PointConv message MLP + masked running-max over neighbors (one tile).

    feat_ref: (K, TM, D)  bf16/f32  neighbor-major slabs, 1.0 bias column folded in
    mask_ref: (TM, K)     f32 {0,1} valid-neighbor mask
    w1_ref:   (D, H)      bf16/f32  (b1 appended as last row)
    w2_ref:   (H, C)      bf16/f32
    b2_ref:   (1, C)      f32
    out_ref:  (TM, C)     f32
    """
    w1 = w1_ref[...]
    w2 = w2_ref[...]
    k_nbrs = feat_ref.shape[0]

    acc = None
    for k in range(k_nbrs):  # K is small & static -> unrolled at trace time
        xk = feat_ref[k]                                               # (TM, D)
        hk = jnp.dot(xk, w1, preferred_element_type=jnp.float32)      # MXU, f32 acc
        hk = jnp.maximum(hk, 0.0)                                      # ReLU (VPU, f32)
        yk = jnp.dot(hk.astype(w2.dtype), w2,
                     preferred_element_type=jnp.float32)               # (TM, C)
        yk = jnp.where(mask_ref[:, k:k + 1] > 0.5, yk, -BIG)           # invalid never wins
        acc = yk if acc is None else jnp.maximum(acc, yk)
    # b2 hoisted past the max: max_k(y_k + b2) == max_k(y_k) + b2
    out_ref[...] = acc + b2_ref[...]


def pointconv_mlp_max(feat, mask, w1, b1, w2, b2, *, tile_m=256, use_bf16=True):
    """pallas_call wrapper.

    feat: (M, K, D_in)  float32/bfloat16, mask: (M, K) {0,1} / bool
    w1: (D_in, H), b1: (1, H), w2: (H, C_out), b2: (1, C_out)
    returns: (M, C_out) float32
    """
    M, K, D_in = feat.shape
    H = w1.shape[1]
    C_out = w2.shape[1]
    mm_dtype = jnp.bfloat16 if use_bf16 else jnp.float32

    # ---- fold b1 into W1 via a constant 1.0 feature column (D_in -> D_in+1) ----
    feat = jnp.concatenate(
        [feat.astype(mm_dtype), jnp.ones((M, K, 1), mm_dtype)], axis=-1)
    d_aug = D_in + 1
    w1_aug = jnp.concatenate([w1, b1.reshape(1, H)], axis=0).astype(mm_dtype)   # (d_aug, H)
    w2c = w2.astype(mm_dtype)
    b2c = b2.reshape(1, C_out).astype(jnp.float32)
    mask_f = mask.astype(jnp.float32)                                           # (M, K) {0,1}

    # ---- tile sizing: multiples of 16 (bf16 sublane packing), clamp to M ----
    tile_m = max(16, min(int(tile_m), _round_up(M, 16)))
    tile_m = _round_up(tile_m, 16)
    # Prefer >= 2 grid steps when a single tile would cover a large M
    # (v7x has 2 TensorCores; small tiles are never split).
    if tile_m >= _round_up(M, 16) and M >= 256:
        tile_m = _round_up((M + 1) // 2, 16)
    m_pad = _round_up(M, tile_m)

    if m_pad != M:
        feat = jnp.pad(feat, ((0, m_pad - M), (0, 0), (0, 0)))
        mask_f = jnp.pad(mask_f, ((0, m_pad - M), (0, 0)))   # padded rows: all-invalid

    # ---- K-major layout: (K, m_pad, d_aug) so the kernel takes per-k slabs ----
    feat_km = jnp.transpose(feat, (1, 0, 2))

    grid = (m_pad // tile_m,)

    itemsize = jnp.dtype(mm_dtype).itemsize
    flops = 2 * m_pad * K * (d_aug * H + H * C_out)
    bytes_accessed = (feat_km.size * itemsize            # feat stream
                      + mask_f.size * 4                  # mask stream
                      + m_pad * C_out * 4                # output writeback
                      + (w1_aug.size + w2c.size) * itemsize + b2c.size * 4)

    out = pl.pallas_call(
        _sa_pointconv_kernel,
        out_shape=jax.ShapeDtypeStruct((m_pad, C_out), jnp.float32),
        grid=grid,
        in_specs=[
            pl.BlockSpec((K, tile_m, d_aug), lambda i: (0, i, 0)),  # feat (K-major)
            pl.BlockSpec((tile_m, K), lambda i: (i, 0)),            # valid mask
            pl.BlockSpec((d_aug, H), lambda i: (0, 0)),             # W1 (+b1 row), resident
            pl.BlockSpec((H, C_out), lambda i: (0, 0)),             # W2, resident
            pl.BlockSpec((1, C_out), lambda i: (0, 0)),             # b2
        ],
        out_specs=pl.BlockSpec((tile_m, C_out), lambda i: (i, 0)),
        compiler_params=pltpu.CompilerParams(
            dimension_semantics=("parallel",),
            vmem_limit_bytes=32 * 1024 * 1024,
        ),
        cost_estimate=pl.CostEstimate(
            flops=int(flops), transcendentals=0,
            bytes_accessed=int(bytes_accessed)),
    )(feat_km, mask_f, w1_aug, w2c, b2c)

    return out[:M]


# ------------------------------- JAX glue ---------------------------------- #
def _fps_one(pos_b, m):
    """Deterministic farthest point sampling on one batch segment (start at 0)."""
    n = pos_b.shape[0]

    def body(i, carry):
        idx, dmin = carry
        last = idx[i - 1]
        d = jnp.sum((pos_b - pos_b[last]) ** 2, axis=-1)
        dmin = jnp.minimum(dmin, d)
        idx = idx.at[i].set(jnp.argmax(dmin).astype(jnp.int32))
        return idx, dmin

    idx0 = jnp.zeros((m,), jnp.int32)
    dmin0 = jnp.full((n,), jnp.inf, jnp.float32)
    idx, _ = jax.lax.fori_loop(1, m, body, (idx0, dmin0))
    return idx


def sa_module_forward(x, pos, batch, *, ratio, r, max_num_neighbors,
                      num_batches, n_per_batch, w1, b1, w2, b2):
    """Forward pass of SAModule: returns (x_out, selected_pos, selected_batch)."""
    # 1) farthest point sampling (data-dependent argmax loop -> plain JAX glue)
    #    TODO(synk): PyG fps uses random_start=True; deterministic start here.
    if ratio == 1.0:
        sel_idx = jnp.arange(pos.shape[0], dtype=jnp.int32)
    else:
        m = int(math.ceil(ratio * n_per_batch))
        per = []
        for b in range(num_batches):
            pos_b = pos[b * n_per_batch:(b + 1) * n_per_batch]
            per.append(_fps_one(pos_b, m) + b * n_per_batch)
        sel_idx = jnp.concatenate(per, axis=0)
    sel_pos = pos[sel_idx]
    sel_batch = batch[sel_idx]

    # 2) radius neighborhoods within the same batch element (glue)
    d2 = jnp.sum((sel_pos[:, None, :] - pos[None, :, :]) ** 2, axis=-1)   # (M, N)
    valid = (d2 <= r * r) & (sel_batch[:, None] == batch[None, :])
    # first `max_num_neighbors` valid neighbors by index (stable), like radius()
    order = jnp.argsort(jnp.logical_not(valid), axis=1)
    nbr_idx = order[:, :max_num_neighbors]                                # (M, K)
    nbr_mask = jnp.take_along_axis(valid, nbr_idx, axis=1)                # (M, K)

    # 3) PointConv message features in bf16 (gather glue), MLP + max is the kernel
    x_j = x.astype(jnp.bfloat16)[nbr_idx]                                 # (M, K, C_in)
    rel = (pos[nbr_idx] - sel_pos[:, None, :]).astype(jnp.bfloat16)       # (M, K, 3)
    feat = jnp.concatenate([x_j, rel], axis=-1)                           # (M, K, C_in+3)

    out = pointconv_mlp_max(feat, nbr_mask, w1, b1, w2, b2)
    return out, sel_pos, sel_batch


# --------------------------------- main ------------------------------------ #
if __name__ == "__main__":
    key = jax.random.PRNGKey(0)

    B = 2                 # batch elements
    n_per_batch = 16      # points per batch element
    C_in = 4              # input feature channels
    hidden = 32
    C_out = 32
    ratio = 0.5
    r = 0.5
    max_num_neighbors = 8

    N = B * n_per_batch
    kx, kp, kw1, kb1, kw2, kb2 = jax.random.split(key, 6)
    x = jax.random.normal(kx, (N, C_in), dtype=jnp.float32)
    pos = jax.random.uniform(kp, (N, 3), dtype=jnp.float32)
    batch = jnp.repeat(jnp.arange(B, dtype=jnp.int32), n_per_batch)

    D_in = C_in + 3
    w1 = jax.random.normal(kw1, (D_in, hidden), jnp.float32) / math.sqrt(D_in)
    b1 = jax.random.normal(kb1, (1, hidden), jnp.float32) * 0.01
    w2 = jax.random.normal(kw2, (hidden, C_out), jnp.float32) / math.sqrt(hidden)
    b2 = jax.random.normal(kb2, (1, C_out), jnp.float32) * 0.01

    out_x, out_pos, out_batch = sa_module_forward(
        x, pos, batch,
        ratio=ratio, r=r, max_num_neighbors=max_num_neighbors,
        num_batches=B, n_per_batch=n_per_batch,
        w1=w1, b1=b1, w2=w2, b2=b2)

    jax.block_until_ready((out_x, out_pos, out_batch))
    M_sel = B * int(math.ceil(ratio * n_per_batch))
    assert out_x.shape == (M_sel, C_out)
    assert out_pos.shape == (M_sel, 3)
    assert out_batch.shape == (M_sel,)
    assert bool(jnp.all(jnp.isfinite(out_x)))
    print("KERNEL_OK")
</pallas_src>

<mosaic_0001>
module attributes {stable_mosaic.version = 11 : i64} {
  func.func @_sa_pointconv_kernel(%arg0: i32, %arg1: memref<8x16x8xbf16, #tpu.memory_space<vmem>>, %arg2: memref<16x8xf32, #tpu.memory_space<vmem>>, %arg3: memref<8x32xbf16, #tpu.memory_space<vmem>>, %arg4: memref<32x32xbf16, #tpu.memory_space<vmem>>, %arg5: memref<1x32xf32, #tpu.memory_space<vmem>>, %arg6: memref<16x32xf32, #tpu.memory_space<vmem>>) attributes {dimension_semantics = [#tpu.dimension_semantics<parallel>], iteration_bounds = array<i64: 1>, scalar_prefetch = 0 : i64, scratch_operands = 0 : i64, tpu.core_type = #tpu.core_type<tc>, window_params = [{transform_indices = @transform_0, window_bounds = array<i64: 8, 16, 8>}, {transform_indices = @transform_1, window_bounds = array<i64: 16, 8>}, {pipeline_mode = #tpu.pipeline_mode<synchronous>, transform_indices = @transform_2, window_bounds = array<i64: 8, 32>}, {pipeline_mode = #tpu.pipeline_mode<synchronous>, transform_indices = @transform_3, window_bounds = array<i64: 32, 32>}, {pipeline_mode = #tpu.pipeline_mode<synchronous>, transform_indices = @transform_4, window_bounds = array<i64: 1, 32>}, {transform_indices = @transform_5, window_bounds = array<i64: 16, 32>}]} {
    %c0 = arith.constant 0 : index
    %c0_0 = arith.constant 0 : index
    %0 = vector.load %arg3[%c0, %c0_0] : memref<8x32xbf16, #tpu.memory_space<vmem>>, vector<8x32xbf16>
    %c0_1 = arith.constant 0 : index
    %c0_2 = arith.constant 0 : index
    %1 = vector.load %arg4[%c0_1, %c0_2] : memref<32x32xbf16, #tpu.memory_space<vmem>>, vector<32x32xbf16>
    %c0_3 = arith.constant 0 : index
    %c0_4 = arith.constant 0 : index
    %c0_5 = arith.constant 0 : index
    %2 = vector.load %arg1[%c0_3, %c0_4, %c0_5] : memref<8x16x8xbf16, #tpu.memory_space<vmem>>, vector<1x16x8xbf16>
    %3 = vector.shape_cast %2 : vector<1x16x8xbf16> to vector<16x8xbf16>
    %cst = arith.constant dense<0.000000e+00> : vector<16x32xf32>
    %4 = tpu.matmul %3, %0, %cst {dimension_numbers = #tpu.dot_dimension_numbers<[1], [0], [0], [1], [0, 0, 1, 1], [], []>} : vector<16x8xbf16>, vector<8x32xbf16>, vector<16x32xf32> -> vector<16x32xf32>
    %cst_6 = arith.constant 0.000000e+00 : f32
    %5 = vector.broadcast %cst_6 : f32 to vector<16x32xf32>
    %6 = arith.maximumf %4, %5 : vector<16x32xf32>
    %7 = arith.truncf %6 : vector<16x32xf32> to vector<16x32xbf16>
    %cst_7 = arith.constant dense<0.000000e+00> : vector<16x32xf32>
    %8 = tpu.matmul %7, %1, %cst_7 {dimension_numbers = #tpu.dot_dimension_numbers<[1], [0], [0], [1], [0, 0, 1, 1], [], []>} : vector<16x32xbf16>, vector<32x32xbf16>, vector<16x32xf32> -> vector<16x32xf32>
    %c0_8 = arith.constant 0 : index
    %c0_9 = arith.constant 0 : index
    %9 = vector.load %arg2[%c0_8, %c0_9] : memref<16x8xf32, #tpu.memory_space<vmem>>, vector<16x1xf32>
    %cst_10 = arith.constant 5.000000e-01 : f32
    %10 = vector.broadcast %cst_10 : f32 to vector<16x1xf32>
    %11 = arith.cmpf ogt, %9, %10 : vector<16x1xf32>
    %cst_11 = arith.constant -3.000000e+38 : f32
    %12 = vector.shape_cast %11 : vector<16x1xi1> to vector<16x1xi1>
    %13 = vector.broadcast %12 : vector<16x1xi1> to vector<16x32xi1>
    %14 = vector.broadcast %cst_11 : f32 to vector<16x32xf32>
    %15 = arith.select %13, %8, %14 : vector<16x32xi1>, vector<16x32xf32>
    %c1 = arith.constant 1 : index
    %c0_12 = arith.constant 0 : index
    %c0_13 = arith.constant 0 : index
    %16 = vector.load %arg1[%c1, %c0_12, %c0_13] : memref<8x16x8xbf16, #tpu.memory_space<vmem>>, vector<1x16x8xbf16>
    %17 = vector.shape_cast %16 : vector<1x16x8xbf16> to vector<16x8xbf16>
    %cst_14 = arith.constant dense<0.000000e+00> : vector<16x32xf32>
    %18 = tpu.matmul %17, %0, %cst_14 {dimension_numbers = #tpu.dot_dimension_numbers<[1], [0], [0], [1], [0, 0, 1, 1], [], []>} : vector<16x8xbf16>, vector<8x32xbf16>, vector<16x32xf32> -> vector<16x32xf32>
    %cst_15 = arith.constant 0.000000e+00 : f32
    %19 = vector.broadcast %cst_15 : f32 to vector<16x32xf32>
    %20 = arith.maximumf %18, %19 : vector<16x32xf32>
    %21 = arith.truncf %20 : vector<16x32xf32> to vector<16x32xbf16>
    %cst_16 = arith.constant dense<0.000000e+00> : vector<16x32xf32>
    %22 = tpu.matmul %21, %1, %cst_16 {dimension_numbers = #tpu.dot_dimension_numbers<[1], [0], [0], [1], [0, 0, 1, 1], [], []>} : vector<16x32xbf16>, vector<32x32xbf16>, vector<16x32xf32> -> vector<16x32xf32>
    %c0_17 = arith.constant 0 : index
    %c1_18 = arith.constant 1 : index
    %23 = vector.load %arg2[%c0_17, %c1_18] : memref<16x8xf32, #tpu.memory_space<vmem>>, vector<16x1xf32>
    %cst_19 = arith.constant 5.000000e-01 : f32
    %24 = vector.broadcast %cst_19 : f32 to vector<16x1xf32>
    %25 = arith.cmpf ogt, %23, %24 : vector<16x1xf32>
    %cst_20 = arith.constant -3.000000e+38 : f32
    %26 = vector.shape_cast %25 : vector<16x1xi1> to vector<16x1xi1>
    %27 = vector.broadcast %26 : vector<16x1xi1> to vector<16x32xi1>
    %28 = vector.broadcast %cst_20 : f32 to vector<16x32xf32>
    %29 = arith.select %27, %22, %28 : vector<16x32xi1>, vector<16x32xf32>
    %30 = arith.maximumf %15, %29 : vector<16x32xf32>
    %c2 = arith.constant 2 : index
    %c0_21 = arith.constant 0 : index
    %c0_22 = arith.constant 0 : index
    %31 = vector.load %arg1[%c2, %c0_21, %c0_22] : memref<8x16x8xbf16, #tpu.memory_space<vmem>>, vector<1x16x8xbf16>
    %32 = vector.shape_cast %31 : vector<1x16x8xbf16> to vector<16x8xbf16>
    %cst_23 = arith.constant dense<0.000000e+00> : vector<16x32xf32>
    %33 = tpu.matmul %32, %0, %cst_23 {dimension_numbers = #tpu.dot_dimension_numbers<[1], [0], [0], [1], [0, 0, 1, 1], [], []>} : vector<16x8xbf16>, vector<8x32xbf16>, vector<16x32xf32> -> vector<16x32xf32>
    %cst_24 = arith.constant 0.000000e+00 : f32
    %34 = vector.broadcast %cst_24 : f32 to vector<16x32xf32>
    %35 = arith.maximumf %33, %34 : vector<16x32xf32>
    %36 = arith.truncf %35 : vector<16x32xf32> to vector<16x32xbf16>
    %cst_25 = arith.constant dense<0.000000e+00> : vector<16x32xf32>
    %37 = tpu.matmul %36, %1, %cst_25 {dimension_numbers = #tpu.dot_dimension_numbers<[1], [0], [0], [1], [0, 0, 1, 1], [], []>} : vector<16x32xbf16>, vector<32x32xbf16>, vector<16x32xf32> -> vector<16x32xf32>
    %c0_26 = arith.constant 0 : index
    %c2_27 = arith.constant 2 : index
    %38 = vector.load %arg2[%c0_26, %c2_27] : memref<16x8xf32, #tpu.memory_space<vmem>>, vector<16x1xf32>
    %cst_28 = arith.constant 5.000000e-01 : f32
    %39 = vector.broadcast %cst_28 : f32 to vector<16x1xf32>
    %40 = arith.cmpf ogt, %38, %39 : vector<16x1xf32>
    %cst_29 = arith.constant -3.000000e+38 : f32
    %41 = vector.shape_cast %40 : vector<16x1xi1> to vector<16x1xi1>
    %42 = vector.broadcast %41 : vector<16x1xi1> to vector<16x32xi1>
    %43 = vector.broadcast %cst_29 : f32 to vector<16x32xf32>
    %44 = arith.select %42, %37, %43 : vector<16x32xi1>, vector<16x32xf32>
    %45 = arith.maximumf %30, %44 : vector<16x32xf32>
    %c3 = arith.constant 3 : index
    %c0_30 = arith.constant 0 : index
    %c0_31 = arith.constant 0 : index
    %46 = vector.load %arg1[%c3, %c0_30, %c0_31] : memref<8x16x8xbf16, #tpu.memory_space<vmem>>, vector<1x16x8xbf16>
    %47 = vector.shape_cast %46 : vector<1x16x8xbf16> to vector<16x8xbf16>
    %cst_32 = arith.constant dense<0.000000e+00> : vector<16x32xf32>
    %48 = tpu.matmul %47, %0, %cst_32 {dimension_numbers = #tpu.dot_dimension_numbers<[1], [0], [0], [1], [0, 0, 1, 1], [], []>} : vector<16x8xbf16>, vector<8x32xbf16>, vector<16x32xf32> -> vector<16x32xf32>
    %cst_33 = arith.constant 0.000000e+00 : f32
    %49 = vector.broadcast %cst_33 : f32 to vector<16x32xf32>
    %50 = arith.maximumf %48, %49 : vector<16x32xf32>
    %51 = arith.truncf %50 : vector<16x32xf32> to vector<16x32xbf16>
    %cst_34 = arith.constant dense<0.000000e+00> : vector<16x32xf32>
    %52 = tpu.matmul %51, %1, %cst_34 {dimension_numbers = #tpu.dot_dimension_numbers<[1], [0], [0], [1], [0, 0, 1, 1], [], []>} : vector<16x32xbf16>, vector<32x32xbf16>, vector<16x32xf32> -> vector<16x32xf32>
    %c0_35 = arith.constant 0 : index
    %c3_36 = arith.constant 3 : index
    %53 = vector.load %arg2[%c0_35, %c3_36] : memref<16x8xf32, #tpu.memory_space<vmem>>, vector<16x1xf32>
    %cst_37 = arith.constant 5.000000e-01 : f32
    %54 = vector.broadcast %cst_37 : f32 to vector<16x1xf32>
    %55 = arith.cmpf ogt, %53, %54 : vector<16x1xf32>
    %cst_38 = arith.constant -3.000000e+38 : f32
    %56 = vector.shape_cast %55 : vector<16x1xi1> to vector<16x1xi1>
    %57 = vector.broadcast %56 : vector<16x1xi1> to vector<16x32xi1>
    %58 = vector.broadcast %cst_38 : f32 to vector<16x32xf32>
    %59 = arith.select %57, %52, %58 : vector<16x32xi1>, vector<16x32xf32>
    %60 = arith.maximumf %45, %59 : vector<16x32xf32>
    %c4 = arith.constant 4 : index
    %c0_39 = arith.constant 0 : index
    %c0_40 = arith.constant 0 : index
    %61 = vector.load %arg1[%c4, %c0_39, %c0_40] : memref<8x16x8xbf16, #tpu.memory_space<vmem>>, vector<1x16x8xbf16>
    %62 = vector.shape_cast %61 : vector<1x16x8xbf16> to vector<16x8xbf16>
    %cst_41 = arith.constant dense<0.000000e+00> : vector<16x32xf32>
    %63 = tpu.matmul %62, %0, %cst_41 {dimension_numbers = #tpu.dot_dimension_numbers<[1], [0], [0], [1], [0, 0, 1, 1], [], []>} : vector<16x8xbf16>, vector<8x32xbf16>, vector<16x32xf32> -> vector<16x32xf32>
    %cst_42 = arith.constant 0.000000e+00 : f32
    %64 = vector.broadcast %cst_42 : f32 to vector<16x32xf32>
    %65 = arith.maximumf %63, %64 : vector<16x32xf32>
    %66 = arith.truncf %65 : vector<16x32xf32> to vector<16x32xbf16>
    %cst_43 = arith.constant dense<0.000000e+00> : vector<16x32xf32>
    %67 = tpu.matmul %66, %1, %cst_43 {dimension_numbers = #tpu.dot_dimension_numbers<[1], [0], [0], [1], [0, 0, 1, 1], [], []>} : vector<16x32xbf16>, vector<32x32xbf16>, vector<16x32xf32> -> vector<16x32xf32>
    %c0_44 = arith.constant 0 : index
    %c4_45 = arith.constant 4 : index
    %68 = vector.load %arg2[%c0_44, %c4_45] : memref<16x8xf32, #tpu.memory_space<vmem>>, vector<16x1xf32>
    %cst_46 = arith.constant 5.000000e-01 : f32
    %69 = vector.broadcast %cst_46 : f32 to vector<16x1xf32>
    %70 = arith.cmpf ogt, %68, %69 : vector<16x1xf32>
    %cst_47 = arith.constant -3.000000e+38 : f32
    %71 = vector.shape_cast %70 : vector<16x1xi1> to vector<16x1xi1>
    %72 = vector.broadcast %71 : vector<16x1xi1> to vector<16x32xi1>
    %73 = vector.broadcast %cst_47 : f32 to vector<16x32xf32>
    %74 = arith.select %72, %67, %73 : vector<16x32xi1>, vector<16x32xf32>
    %75 = arith.maximumf %60, %74 : vector<16x32xf32>
    %c5 = arith.constant 5 : index
    %c0_48 = arith.constant 0 : index
    %c0_49 = arith.constant 0 : index
    %76 = vector.load %arg1[%c5, %c0_48, %c0_49] : memref<8x16x8xbf16, #tpu.memory_space<vmem>>, vector<1x16x8xbf16>
    %77 = vector.shape_cast %76 : vector<1x16x8xbf16> to vector<16x8xbf16>
    %cst_50 = arith.constant dense<0.000000e+00> : vector<16x32xf32>
    %78 = tpu.matmul %77, %0, %cst_50 {dimension_numbers = #tpu.dot_dimension_numbers<[1], [0], [0], [1], [0, 0, 1, 1], [], []>} : vector<16x8xbf16>, vector<8x32xbf16>, vector<16x32xf32> -> vector<16x32xf32>
    %cst_51 = arith.constant 0.000000e+00 : f32
    %79 = vector.broadcast %cst_51 : f32 to vector<16x32xf32>
    %80 = arith.maximumf %78, %79 : vector<16x32xf32>
    %81 = arith.truncf %80 : vector<16x32xf32> to vector<16x32xbf16>
    %cst_52 = arith.constant dense<0.000000e+00> : vector<16x32xf32>
    %82 = tpu.matmul %81, %1, %cst_52 {dimension_numbers = #tpu.dot_dimension_numbers<[1], [0], [0], [1], [0, 0, 1, 1], [], []>} : vector<16x32xbf16>, vector<32x32xbf16>, vector<16x32xf32> -> vector<16x32xf32>
    %c0_53 = arith.constant 0 : index
    %c5_54 = arith.constant 5 : index
    %83 = vector.load %arg2[%c0_53, %c5_54] : memref<16x8xf32, #tpu.memory_space<vmem>>, vector<16x1xf32>
    %cst_55 = arith.constant 5.000000e-01 : f32
    %84 = vector.broadcast %cst_55 : f32 to vector<16x1xf32>
    %85 = arith.cmpf ogt, %83, %84 : vector<16x1xf32>
    %cst_56 = arith.constant -3.000000e+38 : f32
    %86 = vector.shape_cast %85 : vector<16x1xi1> to vector<16x1xi1>
    %87 = vector.broadcast %86 : vector<16x1xi1> to vector<16x32xi1>
    %88 = vector.broadcast %cst_56 : f32 to vector<16x32xf32>
    %89 = arith.select %87, %82, %88 : vector<16x32xi1>, vector<16x32xf32>
    %90 = arith.maximumf %75, %89 : vector<16x32xf32>
    %c6 = arith.constant 6 : index
    %c0_57 = arith.constant 0 : index
    %c0_58 = arith.constant 0 : index
    %91 = vector.load %arg1[%c6, %c0_57, %c0_58] : memref<8x16x8xbf16, #tpu.memory_space<vmem>>, vector<1x16x8xbf16>
    %92 = vector.shape_cast %91 : vector<1x16x8xbf16> to vector<16x8xbf16>
    %cst_59 = arith.constant dense<0.000000e+00> : vector<16x32xf32>
    %93 = tpu.matmul %92, %0, %cst_59 {dimension_numbers = #tpu.dot_dimension_numbers<[1], [0], [0], [1], [0, 0, 1, 1], [], []>} : vector<16x8xbf16>, vector<8x32xbf16>, vector<16x32xf32> -> vector<16x32xf32>
    %cst_60 = arith.constant 0.000000e+00 : f32
    %94 = vector.broadcast %cst_60 : f32 to vector<16x32xf32>
    %95 = arith.maximumf %93, %94 : vector<16x32xf32>
    %96 = arith.truncf %95 : vector<16x32xf32> to vector<16x32xbf16>
    %cst_61 = arith.constant dense<0.000000e+00> : vector<16x32xf32>
    %97 = tpu.matmul %96, %1, %cst_61 {dimension_numbers = #tpu.dot_dimension_numbers<[1], [0], [0], [1], [0, 0, 1, 1], [], []>} : vector<16x32xbf16>, vector<32x32xbf16>, vector<16x32xf32> -> vector<16x32xf32>
    %c0_62 = arith.constant 0 : index
    %c6_63 = arith.constant 6 : index
    %98 = vector.load %arg2[%c0_62, %c6_63] : memref<16x8xf32, #tpu.memory_space<vmem>>, vector<16x1xf32>
    %cst_64 = arith.constant 5.000000e-01 : f32
    %99 = vector.broadcast %cst_64 : f32 to vector<16x1xf32>
    %100 = arith.cmpf ogt, %98, %99 : vector<16x1xf32>
    %cst_65 = arith.constant -3.000000e+38 : f32
    %101 = vector.shape_cast %100 : vector<16x1xi1> to vector<16x1xi1>
    %102 = vector.broadcast %101 : vector<16x1xi1> to vector<16x32xi1>
    %103 = vector.broadcast %cst_65 : f32 to vector<16x32xf32>
    %104 = arith.select %102, %97, %103 : vector<16x32xi1>, vector<16x32xf32>
    %105 = arith.maximumf %90, %104 : vector<16x32xf32>
    %c7 = arith.constant 7 : index
    %c0_66 = arith.constant 0 : index
    %c0_67 = arith.constant 0 : index
    %106 = vector.load %arg1[%c7, %c0_66, %c0_67] : memref<8x16x8xbf16, #tpu.memory_space<vmem>>, vector<1x16x8xbf16>
    %107 = vector.shape_cast %106 : vector<1x16x8xbf16> to vector<16x8xbf16>
    %cst_68 = arith.constant dense<0.000000e+00> : vector<16x32xf32>
    %108 = tpu.matmul %107, %0, %cst_68 {dimension_numbers = #tpu.dot_dimension_numbers<[1], [0], [0], [1], [0, 0, 1, 1], [], []>} : vector<16x8xbf16>, vector<8x32xbf16>, vector<16x32xf32> -> vector<16x32xf32>
    %cst_69 = arith.constant 0.000000e+00 : f32
    %109 = vector.broadcast %cst_69 : f32 to vector<16x32xf32>
    %110 = arith.maximumf %108, %109 : vector<16x32xf32>
    %111 = arith.truncf %110 : vector<16x32xf32> to vector<16x32xbf16>
    %cst_70 = arith.constant dense<0.000000e+00> : vector<16x32xf32>
    %112 = tpu.matmul %111, %1, %cst_70 {dimension_numbers = #tpu.dot_dimension_numbers<[1], [0], [0], [1], [0, 0, 1, 1], [], []>} : vector<16x32xbf16>, vector<32x32xbf16>, vector<16x32xf32> -> vector<16x32xf32>
    %c0_71 = arith.constant 0 : index
    %c7_72 = arith.constant 7 : index
    %113 = vector.load %arg2[%c0_71, %c7_72] : memref<16x8xf32, #tpu.memory_space<vmem>>, vector<16x1xf32>
    %cst_73 = arith.constant 5.000000e-01 : f32
    %114 = vector.broadcast %cst_73 : f32 to vector<16x1xf32>
    %115 = arith.cmpf ogt, %113, %114 : vector<16x1xf32>
    %cst_74 = arith.constant -3.000000e+38 : f32
    %116 = vector.shape_cast %115 : vector<16x1xi1> to vector<16x1xi1>
    %117 = vector.broadcast %116 : vector<16x1xi1> to vector<16x32xi1>
    %118 = vector.broadcast %cst_74 : f32 to vector<16x32xf32>
    %119 = arith.select %117, %112, %118 : vector<16x32xi1>, vector<16x32xf32>
    %120 = arith.maximumf %105, %119 : vector<16x32xf32>
    %c0_75 = arith.constant 0 : index
    %c0_76 = arith.constant 0 : index
    %121 = vector.load %arg5[%c0_75, %c0_76] : memref<1x32xf32, #tpu.memory_space<vmem>>, vector<1x32xf32>
    %122 = vector.broadcast %121 : vector<1x32xf32> to vector<16x32xf32>
    %123 = arith.addf %120, %122 : vector<16x32xf32>
    %c0_77 = arith.constant 0 : index
    %c0_78 = arith.constant 0 : index
    %124 = vector.load %arg6[%c0_77, %c0_78] : memref<16x32xf32, #tpu.memory_space<vmem>>, vector<16x32xf32>
    tpu.vector_store %arg6[%c0_77, %c0_78], %123 {strides = array<i32>} : memref<16x32xf32, #tpu.memory_space<vmem>>, vector<16x32xf32>,
    return
  }
  func.func @transform_0(%arg0: i32) -> (i32, i32, i32) {
    %c0_i32 = arith.constant 0 : i32
    %c0_i32_0 = arith.constant 0 : i32
    %c0_i32_1 = arith.constant 0 : i32
    return %c0_i32, %arg0, %c0_i32_0 : i32, i32, i32
  }
  func.func @transform_1(%arg0: i32) -> (i32, i32) {
    %c0_i32 = arith.constant 0 : i32
    %c0_i32_0 = arith.constant 0 : i32
    return %arg0, %c0_i32 : i32, i32
  }
  func.func @transform_2(%arg0: i32) -> (i32, i32) {
    %c0_i32 = arith.constant 0 : i32
    %c0_i32_0 = arith.constant 0 : i32
    %c0_i32_1 = arith.constant 0 : i32
    return %c0_i32, %c0_i32_0 : i32, i32
  }
  func.func @transform_3(%arg0: i32) -> (i32, i32) {
    %c0_i32 = arith.constant 0 : i32
    %c0_i32_0 = arith.constant 0 : i32
    %c0_i32_1 = arith.constant 0 : i32
    return %c0_i32, %c0_i32_0 : i32, i32
  }
  func.func @transform_4(%arg0: i32) -> (i32, i32) {
    %c0_i32 = arith.constant 0 : i32
    %c0_i32_0 = arith.constant 0 : i32
    %c0_i32_1 = arith.constant 0 : i32
    return %c0_i32, %c0_i32_0 : i32, i32
  }
  func.func @transform_5(%arg0: i32) -> (i32, i32) {
    %c0_i32 = arith.constant 0 : i32
    %c0_i32_0 = arith.constant 0 : i32
    return %arg0, %c0_i32 : i32, i32
  }
}

</mosaic_0001>

<bundles_post_ra>
// kernel: tpu_custom_call.1
= control target key start
LH: loop header
LB: loop body
LE: loop exit
PB: predicated region body
PF: predicated region fallthrough
CT: control target
= control target key end

     0   :  { %vm38_vm0 = vcmask 1043456   ;;  %v1214_v1 = vmov 0.0   ;;  %vm1215_vm1 = vmmov 0   ;;  %vm34_vm2 = vcmask 64512   ;;  %s1396_s0 = inlined_call_operand.vmem [shape: bf16[8,16,8], index: 0, kind: input, shape index: {}]   ;;  %s1397_s1 = inlined_call_operand.vmem [shape: f32[16,8], index: 1, kind: input, shape index: {}]   ;;  %s1398_s2 = inlined_call_operand.vmem [shape: bf16[8,32], index: 2, kind: input, shape index: {}]   ;;  %s1399_s3 = inlined_call_operand.vmem [shape: bf16[32,32], index: 3, kind: input, shape index: {}]   ;;  %s1400_s4 = inlined_call_operand.vmem [shape: f32[1,32], index: 4, kind: input, shape index: {}]   ;;  %s1401_s5 = inlined_call_operand.hbm [shape: f32[16,32], index: 5, kind: output, shape index: {}]  }
   0x1   :  { %v22_v0 = vld [vmem:[%s1398_s2] sm:$0xf]  ;;  %1044 = vmatprep.subr.bf16.mxu0 %v1214_v1  ;;  %1046 = vmatprep.mubr.msk.bf16.mxu0 %vm1215_vm1, %v1214_v1  ;;  %v1183_v4 = vld [vmem:[%s1396_s0 + $0x8] sm:$0xff]  }
   0x2   :  { %v40_v2 = vsel %vm38_vm0, %v22_v0, 0  ;;  %v1182_v3 = vld [vmem:[%s1396_s0] sm:$0xff]   ;;  %1050 = vmatprep.subr.bf16.mxu1 %v1214_v1  ;;  %1054 = vmatprep.mubr.msk.bf16.mxu1 %vm1215_vm1, %v1214_v1 }
   0x3   :  { %1045 = vmatpush3.bf16.msra.mxu0 %v40_v2 }
   0x4   :  { %1058 = vmatprep.subr.bf16.mxu0 %v1214_v1 }
   0x6   :  { %1047 = vmatmul.mubr.msk.bf16.vlgmr.msra.gmra.mxu0 %vm34_vm2, %v1182_v3 }
   0x7   :  { %1059 = vmatpush3.bf16.msra.mxu0 %v40_v2  ;;  %1060 = vmatprep.mubr.msk.bf16.mxu0 %vm1215_vm1, %v1214_v1 }
   0x8   :  { %1072 = vmatprep.subr.bf16.mxu0 %v1214_v1 }
   0x9   :  { %10 = vsyncpa [#allocation3], 0  ;;  %v1184_v5 = vld [vmem:[%s1396_s0 + $0x10] sm:$0xff]   ;;  %v1185_v6 = vld [vmem:[%s1396_s0 + $0x18] sm:$0xff]   ;;  %v1216_v15 = vmov 0   ;;  %v1217_v16 = vmov 1  }
   0xa   :  { %v1186_v7 = vld [vmem:[%s1396_s0 + $0x20] sm:$0xff]   ;;  %v1187_v8 = vld [vmem:[%s1396_s0 + $0x28] sm:$0xff]   ;;  %v1188_v9 = vld [vmem:[%s1396_s0 + $0x30] sm:$0xff]   ;;  %1169 = vset.pattern.permute.xlu0 %v1216_v15  ;;  %1170 = vset.pattern.permute.xlu1 %v1217_v16  ;;  %v1218_v19 = vmov 2   ;;  %v1219_v20 = vmov 3   ;;  %v1220_v21 = vmov 4  }
   0xb   :  { %v1189_v10 = vld [vmem:[%s1396_s0 + $0x38] sm:$0xff]   ;;  %v1322_v11 = vld [vmem:[%s1399_s3 + $0x8] sm:$0xff]   ;;  %v1329_v12 = vld [vmem:[%s1399_s3] sm:$0xff]   ;;  %v1221_v22 = vmov 5   ;;  %v1222_v23 = vmov 6   ;;  %v1223_v24 = vmov 7  }
   0xc   :  { %1051 = vmatpush3.bf16.msra.mxu1 %v1322_v11  ;;  %v143_v13 = vld [vmem:[%s1397_s1] sm:$0xff]  ;;  %v144_v14 = vld [vmem:[%s1397_s1 + $0x8] sm:$0xff]  ;;  %vm98_vm5 = vcmask 261120   ;;  %s1224_s17 = smov [#allocation2]  }
   0xd   :  { %1052 = vmatprep.subr.bf16.mxu1 %v1214_v1  ;;  %vm145_vm3 = vcmp.gt.f32.partialorder %v143_v13, 0.5  ;;  %vm146_vm4 = vcmp.gt.f32.partialorder %v144_v14, 0.5  ;;  %s952_s18 = sshll.u32 %s1224_s17, 4  ;;  %s953_s18 = int_to_ptr.vmem [resolvable:$true] %s952_s18 }
   0xe   :  { %1061 = vmatmul.mubr.msk.bf16.vlgmr.msra.gmra.mxu0 %vm34_vm2, %v1183_v4  ;;  %v147_v17 = vsel %vm145_vm3, 1, %v1216_v15  ;;  %v148_v18 = vsel %vm146_vm4, 1, %v1216_v15  ;;  %p1197_p1 = scmp.lt.s32.totalorder %s953_s18, %s953_s18 }
   0xf   :  { %1073 = vmatpush3.bf16.msra.mxu0 %v40_v2  ;;  %1074 = vmatprep.mubr.msk.bf16.mxu0 %vm1215_vm1, %v1214_v1 }
  0x10   :  { %1086 = vmatprep.subr.bf16.mxu0 %v1214_v1  ;;  %1053 = vmatpush3.bf16.msra.mxu1 %v1329_v12 }
  0x11   :  { %1064 = vmatprep.subr.bf16.mxu1 %v1214_v1  ;;  %150 = vperm.xlu0 %1169, %v147_v17  }
  0x12   :  { %259 = vperm.xlu1 %1170, %v147_v17  }
  0x15   :  { %153 = vperm.xlu0 %1169, %v148_v18  }
  0x16   :  { %1075 = vmatmul.mubr.msk.bf16.vlgmr.msra.gmra.mxu0 %vm34_vm2, %v1184_v5  ;;  %262 = vperm.xlu1 %1170, %v148_v18  }
  0x17   :  { %1087 = vmatpush3.bf16.msra.mxu0 %v40_v2  ;;  %1088 = vmatprep.mubr.msk.bf16.mxu0 %vm1215_vm1, %v1214_v1 }
  0x18   :  { %1100 = vmatprep.subr.bf16.mxu0 %v1214_v1 }
  0x19   :  { %1171 = vset.pattern.permute.xlu0 %v1218_v19 }
  0x1a   :  { %1172 = vset.pattern.permute.xlu1 %v1218_v19  ;;  %370 = vperm.xlu0 %1171, %v147_v17  }
  0x1b   :  { %373 = vperm.xlu1 %1172, %v148_v18  }
  0x1e   :  { %1089 = vmatmul.mubr.msk.bf16.vlgmr.msra.gmra.mxu0 %vm34_vm2, %v1185_v6  ;;  %1174 = vset.pattern.permute.xlu0 %v1219_v20 }
  0x1f   :  { %1101 = vmatpush3.bf16.msra.mxu0 %v40_v2  ;;  %1102 = vmatprep.mubr.msk.bf16.mxu0 %vm1215_vm1, %v1214_v1 }
  0x20   :  { %1114 = vmatprep.subr.bf16.mxu0 %v1214_v1  ;;  %1173 = vset.pattern.permute.xlu1 %v1219_v20 }
  0x21   :  { %481 = vperm.xlu1 %1173, %v147_v17   ;;  %484 = vperm.xlu0 %1174, %v148_v18  }
  0x25   :  { %1175 = vset.pattern.permute.xlu1 %v1220_v21  ;;  %1176 = vset.pattern.permute.xlu0 %v1221_v22 }
  0x26   :  { %1103 = vmatmul.mubr.msk.bf16.vlgmr.msra.gmra.mxu0 %vm34_vm2, %v1186_v7  ;;  %592 = vperm.xlu1 %1175, %v147_v17  }
  0x27   :  { %1115 = vmatpush3.bf16.msra.mxu0 %v40_v2  ;;  %1116 = vmatprep.mubr.msk.bf16.mxu0 %vm1215_vm1, %v1214_v1 }
  0x28   :  { %1128 = vmatprep.subr.bf16.mxu0 %v1214_v1  ;;  %703 = vperm.xlu0 %1176, %v147_v17  }
  0x2a   :  { %595 = vperm.xlu1 %1175, %v148_v18  }
  0x2c   :  { %1179 = vset.pattern.permute.xlu0 %v1222_v23 }
  0x2d   :  { %817 = vperm.xlu0 %1179, %v148_v18  }
  0x2e   :  { %1117 = vmatmul.mubr.msk.bf16.vlgmr.msra.gmra.mxu0 %vm34_vm2, %v1187_v8  ;;  %1177 = vset.pattern.permute.xlu1 %v1221_v22 }
  0x2f   :  { %1129 = vmatpush3.bf16.msra.mxu0 %v40_v2  ;;  %1130 = vmatprep.mubr.msk.bf16.mxu0 %vm1215_vm1, %v1214_v1 }
  0x30   :  { %1142 = vmatprep.subr.bf16.mxu0 %v1214_v1  ;;  %706 = vperm.xlu1 %1177, %v148_v18  }
  0x31   :  { %1181 = vset.pattern.permute.xlu0 %v1223_v24 }
  0x34   :  { %1178 = vset.pattern.permute.xlu1 %v1222_v23 }
  0x35   :  { %814 = vperm.xlu1 %1178, %v147_v17  }
  0x36   :  { %1131 = vmatmul.mubr.msk.bf16.vlgmr.msra.gmra.mxu0 %vm34_vm2, %v1188_v9 }
  0x37   :  { %1143 = vmatpush3.bf16.msra.mxu0 %v40_v2  ;;  %1144 = vmatprep.mubr.msk.bf16.mxu0 %vm1215_vm1, %v1214_v1 }
  0x39   :  { %1180 = vset.pattern.permute.xlu1 %v1223_v24 }
  0x3a   :  { %925 = vperm.xlu1 %1180, %v147_v17  }
  0x3e   :  { %1145 = vmatmul.mubr.msk.bf16.vlgmr.msra.gmra.mxu0 %vm34_vm2, %v1189_v10  ;;  %928 = vperm.xlu1 %1180, %v148_v18  }
  0xc6   :  { %v76_v25 = vpop.f32.mrf.mxu0 }
  0xc7   :  { %v83_v28 = vmax.f32 %v76_v25, 0.0 }
  0xc8   :  { %v1048_v26 = vpop.f32.mrf.mxu0 }
  0xca   :  { %v79_v27 = vpop.f32.mrf.mxu0 }
  0xcb   :  { %v84_v29 = vmax.f32 %v79_v27, 0.0 }
  0xcc   :  { %v1049_v30 = vpop.f32.mrf.mxu0 }
  0xcd   :  { %v85_v31 = vpack.c.bf16 %v84_v29, %v83_v28 }
  0xce   :  { %v204_v32 = vpop.f32.mrf.mxu0 }
  0xcf   :  { %1055 = vmatmul.mubr.msk.bf16.vlgmr.msra.gmra.mxu1 %vm98_vm5, %v85_v31  ;;  %v211_v35 = vmax.f32 %v204_v32, 0.0 }
  0xd0   :  { %v1062_v33 = vpop.f32.mrf.mxu0  ;;  %1065 = vmatpush3.bf16.msra.mxu1 %v1322_v11  ;;  %1068 = vmatprep.mubr.msk.bf16.mxu1 %vm1215_vm1, %v1214_v1 }
  0xd1   :  { %1066 = vmatprep.subr.bf16.mxu1 %v1214_v1 }
  0xd2   :  { %v207_v34 = vpop.f32.mrf.mxu0 }
  0xd3   :  { %v212_v36 = vmax.f32 %v207_v34, 0.0 }
  0xd4   :  { %v1063_v37 = vpop.f32.mrf.mxu0  ;;  %1067 = vmatpush3.bf16.msra.mxu1 %v1329_v12 }
  0xd5   :  { %v213_v38 = vpack.c.bf16 %v212_v36, %v211_v35  ;;  %1078 = vmatprep.subr.bf16.mxu1 %v1214_v1  ;;  %v151_v35 = vpop.permute.xlu0 %150 }
  0xd6   :  { %v315_v39 = vpop.f32.mrf.mxu0  ;;  %vm155_vm7 = vcmp.eq.s32.totalorder %v151_v35, 1 }
  0xd7   :  { %1069 = vmatmul.mubr.msk.bf16.vlgmr.msra.gmra.mxu1 %vm98_vm5, %v213_v38  ;;  %v322_v42 = vmax.f32 %v315_v39, 0.0 }
  0xd8   :  { %v1076_v40 = vpop.f32.mrf.mxu0  ;;  %1079 = vmatpush3.bf16.msra.mxu1 %v1322_v11  ;;  %1082 = vmatprep.mubr.msk.bf16.mxu1 %vm1215_vm1, %v1214_v1 }
  0xd9   :  { %1080 = vmatprep.subr.bf16.mxu1 %v1214_v1  ;;  %v154_v40 = vpop.permute.xlu0 %153 }
  0xda   :  { %v318_v41 = vpop.f32.mrf.mxu0  ;;  %vm156_vm11 = vcmp.eq.s32.totalorder %v154_v40, 1 }
  0xdb   :  { %v323_v43 = vmax.f32 %v318_v41, 0.0 }
  0xdc   :  { %v1077_v44 = vpop.f32.mrf.mxu0  ;;  %1081 = vmatpush3.bf16.msra.mxu1 %v1329_v12 }
  0xdd   :  { %v324_v45 = vpack.c.bf16 %v323_v43, %v322_v42  ;;  %1092 = vmatprep.subr.bf16.mxu1 %v1214_v1  ;;  %v371_v44 = vpop.permute.xlu0 %370 }
  0xde   :  { %v426_v46 = vpop.f32.mrf.mxu0  ;;  %vm375_vm8 = vcmp.eq.s32.totalorder %v371_v44, 1 }
  0xdf   :  { %1083 = vmatmul.mubr.msk.bf16.vlgmr.msra.gmra.mxu1 %vm98_vm5, %v324_v45  ;;  %v433_v49 = vmax.f32 %v426_v46, 0.0 }
  0xe0   :  { %v1090_v47 = vpop.f32.mrf.mxu0  ;;  %1093 = vmatpush3.bf16.msra.mxu1 %v1322_v11  ;;  %1096 = vmatprep.mubr.msk.bf16.mxu1 %vm1215_vm1, %v1214_v1 }
  0xe1   :  { %1094 = vmatprep.subr.bf16.mxu1 %v1214_v1 }
  0xe2   :  { %v429_v48 = vpop.f32.mrf.mxu0 }
  0xe3   :  { %v434_v50 = vmax.f32 %v429_v48, 0.0  ;;  %v485_v48 = vpop.permute.xlu0 %484 }
  0xe4   :  { %v1091_v51 = vpop.f32.mrf.mxu0  ;;  %1095 = vmatpush3.bf16.msra.mxu1 %v1329_v12  ;;  %vm487_vm14 = vcmp.eq.s32.totalorder %v485_v48, 1 }
  0xe5   :  { %v435_v52 = vpack.c.bf16 %v434_v50, %v433_v49  ;;  %1106 = vmatprep.subr.bf16.mxu1 %v1214_v1 }
  0xe6   :  { %v537_v53 = vpop.f32.mrf.mxu0 }
  0xe7   :  { %1097 = vmatmul.mubr.msk.bf16.vlgmr.msra.gmra.mxu1 %vm98_vm5, %v435_v52  ;;  %v544_v56 = vmax.f32 %v537_v53, 0.0 }
  0xe8   :  { %v1104_v54 = vpop.f32.mrf.mxu0  ;;  %1107 = vmatpush3.bf16.msra.mxu1 %v1322_v11  ;;  %1110 = vmatprep.mubr.msk.bf16.mxu1 %vm1215_vm1, %v1214_v1 }
  0xe9   :  { %1108 = vmatprep.subr.bf16.mxu1 %v1214_v1  ;;  %v704_v54 = vpop.permute.xlu0 %703 }
  0xea   :  { %v540_v55 = vpop.f32.mrf.mxu0  ;;  %vm708_vm15 = vcmp.eq.s32.totalorder %v704_v54, 1 }
  0xeb   :  { %v545_v57 = vmax.f32 %v540_v55, 0.0 }
  0xec   :  { %v1105_v58 = vpop.f32.mrf.mxu0  ;;  %1109 = vmatpush3.bf16.msra.mxu1 %v1329_v12 }
  0xed   :  { %v546_v59 = vpack.c.bf16 %v545_v57, %v544_v56  ;;  %1120 = vmatprep.subr.bf16.mxu1 %v1214_v1 }
  0xee   :  { %v648_v60 = vpop.f32.mrf.mxu0 }
  0xef   :  { %1111 = vmatmul.mubr.msk.bf16.vlgmr.msra.gmra.mxu1 %vm98_vm5, %v546_v59  ;;  %v655_v63 = vmax.f32 %v648_v60, 0.0 }
  0xf0   :  { %v1118_v61 = vpop.f32.mrf.mxu0  ;;  %1121 = vmatpush3.bf16.msra.mxu1 %v1322_v11  ;;  %1124 = vmatprep.mubr.msk.bf16.mxu1 %vm1215_vm1, %v1214_v1 }
  0xf1   :  { %1122 = vmatprep.subr.bf16.mxu1 %v1214_v1 }
  0xf2   :  { %v651_v62 = vpop.f32.mrf.mxu0 }
  0xf3   :  { %v656_v0 = vmax.f32 %v651_v62, 0.0 }
  0xf4   :  { %v1119_v2 = vpop.f32.mrf.mxu0  ;;  %1123 = vmatpush3.bf16.msra.mxu1 %v1329_v12 }
  0xf5   :  { %v657_v3 = vpack.c.bf16 %v656_v0, %v655_v63  ;;  %1134 = vmatprep.subr.bf16.mxu1 %v1214_v1 }
  0xf6   :  { %v759_v4 = vpop.f32.mrf.mxu0 }
  0xf7   :  { %1125 = vmatmul.mubr.msk.bf16.vlgmr.msra.gmra.mxu1 %vm98_vm5, %v657_v3  ;;  %v766_v7 = vmax.f32 %v759_v4, 0.0 }
  0xf8   :  { %v1132_v5 = vpop.f32.mrf.mxu0  ;;  %1135 = vmatpush3.bf16.msra.mxu1 %v1322_v11  ;;  %1138 = vmatprep.mubr.msk.bf16.mxu1 %vm1215_vm1, %v1214_v1 }
  0xf9   :  { %1136 = vmatprep.subr.bf16.mxu1 %v1214_v1 }
  0xfa   :  { %v762_v6 = vpop.f32.mrf.mxu0 }
  0xfb   :  { %v767_v8 = vmax.f32 %v762_v6, 0.0 }
  0xfc   :  { %v1133_v9 = vpop.f32.mrf.mxu0  ;;  %1137 = vmatpush3.bf16.msra.mxu1 %v1329_v12 }
  0xfd   :  { %v768_v10 = vpack.c.bf16 %v767_v8, %v766_v7  ;;  %1148 = vmatprep.subr.bf16.mxu1 %v1214_v1  ;;  %v818_v7 = vpop.permute.xlu0 %817 }
  0xfe   :  { %v870_v13 = vpop.f32.mrf.mxu0  ;;  %vm820_vm3 = vcmp.eq.s32.totalorder %v818_v7, 1 }
  0xff   :  { %1139 = vmatmul.mubr.msk.bf16.vlgmr.msra.gmra.mxu1 %vm98_vm5, %v768_v10  ;;  %v877_v16 = vmax.f32 %v870_v13, 0.0 }
 0x100   :  { %v1146_v14 = vpop.f32.mrf.mxu0  ;;  %1149 = vmatpush3.bf16.msra.mxu1 %v1322_v11  ;;  %1152 = vmatprep.mubr.msk.bf16.mxu1 %vm1215_vm1, %v1214_v1  ;;  %v260_v11 = vpop.permute.xlu1 %259 }
 0x101   :  { %1150 = vmatprep.subr.bf16.mxu1 %v1214_v1  ;;  %vm264_vm6 = vcmp.eq.s32.totalorder %v260_v11, 1 }
 0x102   :  { %v873_v15 = vpop.f32.mrf.mxu0 }
 0x103   :  { %v878_v17 = vmax.f32 %v873_v15, 0.0 }
 0x104   :  { %v1147_v18 = vpop.f32.mrf.mxu0  ;;  %1151 = vmatpush3.bf16.msra.mxu1 %v1329_v12  ;;  %v263_v28 = vpop.permute.xlu1 %262 }
 0x105   :  { %v879_v19 = vpack.c.bf16 %v878_v17, %v877_v16  ;;  %vm265_vm9 = vcmp.eq.s32.totalorder %v263_v28, 1 }
 0x107   :  { %1153 = vmatmul.mubr.msk.bf16.vlgmr.msra.gmra.mxu1 %vm98_vm5, %v879_v19 }
 0x108   :  { %v374_v30 = vpop.permute.xlu1 %373 }
 0x109   :  { %vm376_vm12 = vcmp.eq.s32.totalorder %v374_v30, 1 }
 0x10c   :  { %v482_v12 = vpop.permute.xlu1 %481 }
 0x10d   :  { %vm486_vm10 = vcmp.eq.s32.totalorder %v482_v12, 1 }
 0x110   :  { %v593_v37 = vpop.permute.xlu1 %592 }
 0x111   :  { %vm597_vm13 = vcmp.eq.s32.totalorder %v593_v37, 1 }
 0x114   :  { %v596_v42 = vpop.permute.xlu1 %595 }
 0x115   :  { %vm598_vm0 = vcmp.eq.s32.totalorder %v596_v42, 1 }
 0x118   :  { %v707_v46 = vpop.permute.xlu1 %706 }
 0x119   :  { %vm709_vm2 = vcmp.eq.s32.totalorder %v707_v46, 1 }
 0x11c   :  { %v815_v55 = vpop.permute.xlu1 %814 }
 0x11d   :  { %vm819_vm1 = vcmp.eq.s32.totalorder %v815_v55, 1 }
 0x120   :  { %v926_v8 = vpop.permute.xlu1 %925 }
 0x121   :  { %vm930_vm4 = vcmp.eq.s32.totalorder %v926_v8, 1 }
 0x124   :  { %v929_v11 = vpop.permute.xlu1 %928 }
 0x18f   :  { %v136_v20 = vpop.f32.mrf.mxu1 }
 0x190   :  { %v157_v52 = vsel %vm155_vm7, %v136_v20, -3e+38 }
 0x191   :  { %v1056_v21 = vpop.f32.mrf.mxu1 }
 0x193   :  { %v139_v22 = vpop.f32.mrf.mxu1 }
 0x194   :  { %v158_v62 = vsel %vm156_vm11, %v139_v22, -3e+38 }
 0x195   :  { %v1057_v23 = vpop.f32.mrf.mxu1 }
 0x196   :  { %v1003_v23 = vld [vmem:[%s1400_s4] ss:$0 sm:$0xff]  ;;  %s1192_s4 = scalar_lea.vmem %s953_s18, 256 }
 0x197   :  { %v251_v24 = vpop.f32.mrf.mxu1  ;;  %p1193_p0 = scmp.ne.s32.totalorder %s953_s18, %s1192_s4  ;;  %p1198_p2 = scmp.lt.s32.totalorder %s1192_s4, %s1192_s4 }
 0x198   :  { %v266_v50 = vsel %vm264_vm6, %v251_v24, -3e+38  ;;  %vm931_vm6 = vcmp.eq.s32.totalorder %v929_v11, 1 }
 0x199   :  { %v1070_v25 = vpop.f32.mrf.mxu1  ;;  %v268_v56 = vmax.f32 %v157_v52, %v266_v50  ;;  %p1199_p3 = por %p1198_p2, %p1197_p1 }
 0x19b   :  { %v254_v26 = vpop.f32.mrf.mxu1  ;;  %p1200_p4 = pnand %p1199_p3, %p1193_p0 }
 0x19c   :  { %v267_v58 = vsel %vm265_vm9, %v254_v26, -3e+38 }
 0x19d   :  { %v1071_v27 = vpop.f32.mrf.mxu1  ;;  %v269_v2 = vmax.f32 %v158_v62, %v267_v58 }
 0x19f   :  { %v362_v1 = vpop.f32.mrf.mxu1 }
 0x1a0   :  { %v377_v53 = vsel %vm375_vm8, %v362_v1, -3e+38 }
 0x1a1   :  { %v1084_v29 = vpop.f32.mrf.mxu1  ;;  %v379_v60 = vmax.f32 %v268_v56, %v377_v53 }
 0x1a3   :  { %v365_v31 = vpop.f32.mrf.mxu1 }
 0x1a4   :  { %v378_v63 = vsel %vm376_vm12, %v365_v31, -3e+38 }
 0x1a5   :  { %v1085_v32 = vpop.f32.mrf.mxu1  ;;  %v380_v9 = vmax.f32 %v269_v2, %v378_v63 }
 0x1a7   :  { %v473_v33 = vpop.f32.mrf.mxu1 }
 0x1a8   :  { %v488_v59 = vsel %vm486_vm10, %v473_v33, -3e+38 }
 0x1a9   :  { %v1098_v34 = vpop.f32.mrf.mxu1  ;;  %v490_v3 = vmax.f32 %v379_v60, %v488_v59 }
 0x1ab   :  { %v476_v36 = vpop.f32.mrf.mxu1 }
 0x1ac   :  { %v489_v5 = vsel %vm487_vm14, %v476_v36, -3e+38 }
 0x1ad   :  { %v1099_v38 = vpop.f32.mrf.mxu1  ;;  %v491_v16 = vmax.f32 %v380_v9, %v489_v5 }
 0x1af   :  { %v584_v39 = vpop.f32.mrf.mxu1 }
 0x1b0   :  { %v599_v0 = vsel %vm597_vm13, %v584_v39, -3e+38 }
 0x1b1   :  { %v1112_v41 = vpop.f32.mrf.mxu1  ;;  %v601_v10 = vmax.f32 %v490_v3, %v599_v0 }
 0x1b3   :  { %v587_v43 = vpop.f32.mrf.mxu1 }
 0x1b4   :  { %v600_v14 = vsel %vm598_vm0, %v587_v43, -3e+38 }
 0x1b5   :  { %v1113_v45 = vpop.f32.mrf.mxu1  ;;  %v602_v20 = vmax.f32 %v491_v16, %v600_v14 }
 0x1b7   :  { %v695_v47 = vpop.f32.mrf.mxu1 }
 0x1b8   :  { %v710_v6 = vsel %vm708_vm15, %v695_v47, -3e+38 }
 0x1b9   :  { %v1126_v49 = vpop.f32.mrf.mxu1  ;;  %v712_v17 = vmax.f32 %v601_v10, %v710_v6 }
 0x1bb   :  { %v698_v51 = vpop.f32.mrf.mxu1 }
 0x1bc   :  { %v711_v19 = vsel %vm709_vm2, %v698_v51, -3e+38 }
 0x1bd   :  { %v1127_v57 = vpop.f32.mrf.mxu1  ;;  %v713_v26 = vmax.f32 %v602_v20, %v711_v19 }
 0x1bf   :  { %v806_v61 = vpop.f32.mrf.mxu1 }
 0x1c0   :  { %v821_v15 = vsel %vm819_vm1, %v806_v61, -3e+38 }
 0x1c1   :  { %v1140_v4 = vpop.f32.mrf.mxu1  ;;  %v823_v21 = vmax.f32 %v712_v17, %v821_v15 }
 0x1c3   :  { %v809_v13 = vpop.f32.mrf.mxu1 }
 0x1c4   :  { %v822_v24 = vsel %vm820_vm3, %v809_v13, -3e+38 }
 0x1c5   :  { %v1141_v18 = vpop.f32.mrf.mxu1  ;;  %v824_v1 = vmax.f32 %v713_v26, %v822_v24 }
 0x1c7   :  { %v917_v22 = vpop.f32.mrf.mxu1 }
 0x1c8   :  { %v932_v25 = vsel %vm930_vm4, %v917_v22, -3e+38 }
 0x1c9   :  { %v934_v27 = vmax.f32 %v823_v21, %v932_v25  ;;  %v1154_v28 = vpop.f32.mrf.mxu1 }
 0x1cb   :  { %v943_v29 = vadd.f32 %v1003_v23, %v934_v27  ;;  %v920_v30 = vpop.f32.mrf.mxu1 }
 0x1cc   :  { %v933_v31 = vsel %vm931_vm6, %v920_v30, -3e+38 }
 0x1cd   :  { %945 = vst.msk [vmem:[#allocation2] sm:$0xff] %vm98_vm5, %v943_v29  ;;  %v935_v32 = vmax.f32 %v824_v1, %v933_v31  ;;  %v1155_v33 = vpop.f32.mrf.mxu1 }
 0x1cf   :  { %v944_v12 = vadd.f32 %v1003_v23, %v935_v32 }
 0x1d1   :  { %946 = vst.msk [vmem:[#allocation2 + $0x8] sm:$0xff] %vm98_vm5, %v944_v12 }
 0x1d2   :  { %1203 = shalt.err (!%p1200_p4)
}
 0x1d3   :  { %s1225_s19 = smov 128   ;;  %s1226_s20 = smov 8  }
 0x1d4   :  { %958 = dma.vmem_to_hbm [thread:$0]  %s953_s18, 256, %s1401_s5, [#allocation3], %s1225_s19, %s1225_s19, %s1226_s20  }
 0x1d5   :  { %1212 = dma.done.wait [#allocation3], 256  }
 0x1d6   :  { %1213 = vsyncadd [#allocation3], 4294967040 }
 0x1d7   :  { %962 = vsyncpa [#allocation3], 1 }

</bundles_post_ra>
